<compile_context>
chip_gen: v7x
topology: tpu7x:2x2x1
jax: 0.10.0
libtpu: 0.0.40
codegen_flags: <defaults>
</compile_context>

<pallas_src>
import functools

import jax
import jax.numpy as jnp
from jax.experimental import pallas as pl
from jax.experimental.pallas import tpu as pltpu

NUM_CHAMPIONS = 16   # global NUM_CHAMPIONS used by the PyTorch forward
NUM_FEATURES = 12
NUM_SLOTS = 10       # 10 champion id columns
ONE_HOT_WIDTH = NUM_SLOTS * NUM_CHAMPIONS
IN_WIDTH = NUM_SLOTS + NUM_FEATURES   # 22 input columns

# Optional v5e speedup: run MXU operands in bf16 (f32 accumulation).  Exact for
# the one-hot / id operands; weight casts relax accuracy to ~1e-3, so it is off
# by default to keep the 1e-5 reference check.
USE_BF16_MATMUL = False


def _mm(a, b):
    if USE_BF16_MATMUL:
        a = a.astype(jnp.bfloat16)
        b = b.astype(jnp.bfloat16)
    return jnp.dot(a, b, preferred_element_type=jnp.float32)


# Contract the last dim of both operands: A[m,k] x B[n,k] -> [m,n] (no transpose op).
_NT_DIMS = (((1,), (1,)), ((), ()))


def _mm_nt(a, b):
    if USE_BF16_MATMUL:
        a = a.astype(jnp.bfloat16)
        b = b.astype(jnp.bfloat16)
    return jax.lax.dot_general(a, b, _NT_DIMS, preferred_element_type=jnp.float32)


def lol_onehot_kernel(x_ref, sel_ref, cls_ref, w1_ref, b1_ref, w2_ref, b2_ref,
                      w3a_ref, w3b_ref, b3_ref, w4t_ref, b4_ref, o_ref):
    x = x_ref[...]                                                # [TB, 22] f32

    # champ_ids = x[:, :10].long().clamp(0, NUM_CHAMPIONS - 1)
    champ = jnp.clip(x[:, :NUM_SLOTS].astype(jnp.int32), 0, NUM_CHAMPIONS - 1)
    feats = x[:, NUM_SLOTS:]                                      # [TB, F]

    # feature_layer: Linear(F,64) -> ReLU -> Linear(64,32) -> ReLU
    h1 = jnp.maximum(_mm(feats, w1_ref[...]) + b1_ref[...], 0.0)
    h2 = jnp.maximum(_mm(h1, w2_ref[...]) + b2_ref[...], 0.0)

    # Wide one-hot [TB, 160] (slot-major, matching torch's .view(B, -1)):
    #   champ_bcast[b, j] = champ[b, j // NC]   via the resident [10,160] selector
    #   one_hot[b, j]     = (champ_bcast[b, j] == j % NC)   (resident class row)
    # Equality is exact: champ in [0, 15] is exactly representable on this path.
    champ_bcast = _mm(champ.astype(jnp.float32), sel_ref[...])    # [TB, 160]
    one_hot = (champ_bcast == cls_ref[...]).astype(jnp.float32)

    # output_layer: Linear(10*NC + 32, 64) -> ReLU -> Linear(64, 1) -> Sigmoid
    z = _mm(one_hot, w3a_ref[...]) + _mm(h2, w3b_ref[...]) + b3_ref[...]
    h3 = jnp.maximum(z, 0.0)

    # Final Linear(64, 1) as [1,64] x [TB,64]^T -> lane-dense [1, TB] row.
    logits = _mm_nt(w4t_ref[...], h3)                             # [1, TB]
    o_ref[...] = jax.nn.sigmoid(logits + b4_ref[...])


def _round_up(n, m):
    return (n + m - 1) // m * m


@functools.partial(jax.jit, static_argnames=("tb",))
def lol_model_onehot(x, params, *, tb=4096):
    """Pallas forward.  x: [B, 10 + NUM_FEATURES] float32 -> [B, 1] float32."""
    w1, b1, w2, b2, w3a, w3b, b3, w4t, b4 = params
    B = x.shape[0]

    if B <= tb:
        TB = _round_up(B, 8)            # single tile
    else:
        TB = _round_up(tb, 128)         # multi-tile: lane-dense out block alignment
    B_pad = _round_up(B, TB)
    x_p = jnp.pad(x, ((0, B_pad - B), (0, 0))) if B_pad != B else x

    # Constant index tables (hoisted out of the kernel body; constant-folded by XLA
    # and kept VMEM-resident across grid steps).
    j = jnp.arange(ONE_HOT_WIDTH, dtype=jnp.int32)
    slots = jnp.arange(NUM_SLOTS, dtype=jnp.int32)
    sel = (j[None, :] // NUM_CHAMPIONS == slots[:, None]).astype(jnp.float32)  # [10,160]
    cls_row = (j % NUM_CHAMPIONS).astype(jnp.float32)[None, :]                 # [1,160]

    weights = (w1, b1, w2, b2, w3a, w3b, b3, w4t, b4)
    resident = (sel, cls_row) + weights
    in_specs = (
        [pl.BlockSpec((TB, IN_WIDTH), lambda i: (i, 0))]           # streamed per tile
        # Constants + weights/biases: full-extent blocks with constant block index
        # -> kept VMEM-resident across grid steps (no re-DMA).
        + [pl.BlockSpec(a.shape, lambda i: (0, 0)) for a in resident]
    )

    num_tiles = B_pad // TB
    out = pl.pallas_call(
        lol_onehot_kernel,
        out_shape=jax.ShapeDtypeStruct((1, B_pad), jnp.float32),
        grid=(num_tiles,),
        in_specs=in_specs,
        out_specs=pl.BlockSpec((1, TB), lambda i: (0, i)),         # lane-dense row
        compiler_params=pltpu.CompilerParams(
            dimension_semantics=("parallel",),                     # megacore sharding
            vmem_limit_bytes=32 * 1024 * 1024),
    )(x_p, sel, cls_row, *weights)

    return out[0, :B, None]                                        # [B, 1]


def init_params(key):
    ks = jax.random.split(key, 9)
    scale = 0.1
    w1 = scale * jax.random.normal(ks[0], (NUM_FEATURES, 64), jnp.float32)
    b1 = scale * jax.random.normal(ks[1], (1, 64), jnp.float32)
    w2 = scale * jax.random.normal(ks[2], (64, 32), jnp.float32)
    b2 = scale * jax.random.normal(ks[3], (1, 32), jnp.float32)
    # output_layer Linear(10*NC + 32, 64) split into one-hot part / feature part
    w3a = scale * jax.random.normal(ks[4], (ONE_HOT_WIDTH, 64), jnp.float32)
    w3b = scale * jax.random.normal(ks[5], (32, 64), jnp.float32)
    b3 = scale * jax.random.normal(ks[6], (1, 64), jnp.float32)
    w4t = scale * jax.random.normal(ks[7], (1, 64), jnp.float32)   # Linear(64,1).weight
    b4 = scale * jax.random.normal(ks[8], (1, 1), jnp.float32)
    return (w1, b1, w2, b2, w3a, w3b, b3, w4t, b4)


def ref_forward(x, params):
    """Pure-JAX reference mirroring the PyTorch forward."""
    w1, b1, w2, b2, w3a, w3b, b3, w4t, b4 = params
    champ = jnp.clip(x[:, :NUM_SLOTS].astype(jnp.int32), 0, NUM_CHAMPIONS - 1)
    one_hot = jax.nn.one_hot(champ, NUM_CHAMPIONS, dtype=jnp.float32)
    one_hot = one_hot.reshape(x.shape[0], -1)
    feats = x[:, NUM_SLOTS:]
    h1 = jax.nn.relu(feats @ w1 + b1)
    h2 = jax.nn.relu(h1 @ w2 + b2)
    h3 = jax.nn.relu(one_hot @ w3a + h2 @ w3b + b3)
    return jax.nn.sigmoid(h3 @ w4t.T + b4)


if __name__ == "__main__":
    key = jax.random.PRNGKey(0)
    k_params, k_ids, k_feat = jax.random.split(key, 3)
    params = init_params(k_params)

    def make_batch(kid, kft, B):
        # champion ids as floats (some > NUM_CHAMPIONS-1 to exercise the clamp)
        champ_ids = jax.random.randint(
            kid, (B, NUM_SLOTS), 0, NUM_CHAMPIONS + 4).astype(jnp.float32)
        feats = jax.random.normal(kft, (B, NUM_FEATURES), jnp.float32)
        return jnp.concatenate([champ_ids, feats], axis=1)   # [B, 10 + F]

    # (a) tiny batch -> single tile
    x_small = make_batch(k_ids, k_feat, 8)
    out_small = jax.block_until_ready(lol_model_onehot(x_small, params))
    ref_small = ref_forward(x_small, params)
    assert out_small.shape == (8, 1)
    assert bool(jnp.all(jnp.isfinite(out_small)))
    assert bool(jnp.allclose(out_small, ref_small, atol=1e-5, rtol=1e-5))

    # (b) multi-tile batch with ragged tail (exercises padding + pipelining +
    #     the lane-dense multi-tile output path)
    k_ids2, k_feat2 = jax.random.split(jax.random.PRNGKey(1))
    x_big = make_batch(k_ids2, k_feat2, 300)
    out_big = jax.block_until_ready(lol_model_onehot(x_big, params, tb=128))
    ref_big = ref_forward(x_big, params)
    assert out_big.shape == (300, 1)
    assert bool(jnp.all(jnp.isfinite(out_big)))
    assert bool(jnp.allclose(out_big, ref_big, atol=1e-5, rtol=1e-5))

    print("KERNEL_OK")
</pallas_src>

<mosaic_0001>
module attributes {stable_mosaic.version = 11 : i64} {
  func.func @lol_onehot_kernel(%arg0: i32, %arg1: memref<8x22xf32, #tpu.memory_space<vmem>>, %arg2: memref<10x160xf32, #tpu.memory_space<vmem>>, %arg3: memref<1x160xf32, #tpu.memory_space<vmem>>, %arg4: memref<12x64xf32, #tpu.memory_space<vmem>>, %arg5: memref<1x64xf32, #tpu.memory_space<vmem>>, %arg6: memref<64x32xf32, #tpu.memory_space<vmem>>, %arg7: memref<1x32xf32, #tpu.memory_space<vmem>>, %arg8: memref<160x64xf32, #tpu.memory_space<vmem>>, %arg9: memref<32x64xf32, #tpu.memory_space<vmem>>, %arg10: memref<1x64xf32, #tpu.memory_space<vmem>>, %arg11: memref<1x64xf32, #tpu.memory_space<vmem>>, %arg12: memref<1x1xf32, #tpu.memory_space<vmem>>, %arg13: memref<1x8xf32, #tpu.memory_space<vmem>>) attributes {dimension_semantics = [#tpu.dimension_semantics<parallel>], iteration_bounds = array<i64: 1>, scalar_prefetch = 0 : i64, scratch_operands = 0 : i64, tpu.core_type = #tpu.core_type<tc>, window_params = [{transform_indices = @transform_0, window_bounds = array<i64: 8, 22>}, {pipeline_mode = #tpu.pipeline_mode<synchronous>, transform_indices = @transform_1, window_bounds = array<i64: 10, 160>}, {pipeline_mode = #tpu.pipeline_mode<synchronous>, transform_indices = @transform_2, window_bounds = array<i64: 1, 160>}, {pipeline_mode = #tpu.pipeline_mode<synchronous>, transform_indices = @transform_3, window_bounds = array<i64: 12, 64>}, {pipeline_mode = #tpu.pipeline_mode<synchronous>, transform_indices = @transform_4, window_bounds = array<i64: 1, 64>}, {pipeline_mode = #tpu.pipeline_mode<synchronous>, transform_indices = @transform_5, window_bounds = array<i64: 64, 32>}, {pipeline_mode = #tpu.pipeline_mode<synchronous>, transform_indices = @transform_6, window_bounds = array<i64: 1, 32>}, {pipeline_mode = #tpu.pipeline_mode<synchronous>, transform_indices = @transform_7, window_bounds = array<i64: 160, 64>}, {pipeline_mode = #tpu.pipeline_mode<synchronous>, transform_indices = @transform_8, window_bounds = array<i64: 32, 64>}, {pipeline_mode = #tpu.pipeline_mode<synchronous>, transform_indices = @transform_9, window_bounds = array<i64: 1, 64>}, {pipeline_mode = #tpu.pipeline_mode<synchronous>, transform_indices = @transform_10, window_bounds = array<i64: 1, 64>}, {pipeline_mode = #tpu.pipeline_mode<synchronous>, transform_indices = @transform_11, window_bounds = array<i64: 1, 1>}, {transform_indices = @transform_12, window_bounds = array<i64: 1, 8>}]} {
    %c0 = arith.constant 0 : index
    %c0_0 = arith.constant 0 : index
    %0 = vector.load %arg1[%c0, %c0_0] : memref<8x22xf32, #tpu.memory_space<vmem>>, vector<8x22xf32>
    %1 = vector.extract_strided_slice %0 {offsets = [0, 0], sizes = [8, 10], strides = [1, 1]} : vector<8x22xf32> to vector<8x10xf32>
    %2 = arith.fptosi %1 : vector<8x10xf32> to vector<8x10xi32>
    %c0_i32 = arith.constant 0 : i32
    %c15_i32 = arith.constant 15 : i32
    %3 = vector.broadcast %c0_i32 : i32 to vector<8x10xi32>
    %4 = arith.maxsi %3, %2 : vector<8x10xi32>
    %5 = vector.broadcast %c15_i32 : i32 to vector<8x10xi32>
    %6 = arith.minsi %5, %4 : vector<8x10xi32>
    %7 = vector.extract_strided_slice %0 {offsets = [0, 10], sizes = [8, 12], strides = [1, 1]} : vector<8x22xf32> to vector<8x12xf32>
    %c0_1 = arith.constant 0 : index
    %c0_2 = arith.constant 0 : index
    %8 = vector.load %arg4[%c0_1, %c0_2] : memref<12x64xf32, #tpu.memory_space<vmem>>, vector<12x64xf32>
    %cst = arith.constant dense<0.000000e+00> : vector<8x64xf32>
    %9 = tpu.matmul %7, %8, %cst {dimension_numbers = #tpu.dot_dimension_numbers<[1], [0], [0], [1], [0, 0, 1, 1], [], []>} : vector<8x12xf32>, vector<12x64xf32>, vector<8x64xf32> -> vector<8x64xf32>
    %c0_3 = arith.constant 0 : index
    %c0_4 = arith.constant 0 : index
    %10 = vector.load %arg5[%c0_3, %c0_4] : memref<1x64xf32, #tpu.memory_space<vmem>>, vector<1x64xf32>
    %11 = vector.broadcast %10 : vector<1x64xf32> to vector<8x64xf32>
    %12 = arith.addf %9, %11 : vector<8x64xf32>
    %cst_5 = arith.constant 0.000000e+00 : f32
    %13 = vector.broadcast %cst_5 : f32 to vector<8x64xf32>
    %14 = arith.maximumf %12, %13 : vector<8x64xf32>
    %c0_6 = arith.constant 0 : index
    %c0_7 = arith.constant 0 : index
    %15 = vector.load %arg6[%c0_6, %c0_7] : memref<64x32xf32, #tpu.memory_space<vmem>>, vector<64x32xf32>
    %cst_8 = arith.constant dense<0.000000e+00> : vector<8x32xf32>
    %16 = tpu.matmul %14, %15, %cst_8 {dimension_numbers = #tpu.dot_dimension_numbers<[1], [0], [0], [1], [0, 0, 1, 1], [], []>} : vector<8x64xf32>, vector<64x32xf32>, vector<8x32xf32> -> vector<8x32xf32>
    %c0_9 = arith.constant 0 : index
    %c0_10 = arith.constant 0 : index
    %17 = vector.load %arg7[%c0_9, %c0_10] : memref<1x32xf32, #tpu.memory_space<vmem>>, vector<1x32xf32>
    %18 = vector.broadcast %17 : vector<1x32xf32> to vector<8x32xf32>
    %19 = arith.addf %16, %18 : vector<8x32xf32>
    %cst_11 = arith.constant 0.000000e+00 : f32
    %20 = vector.broadcast %cst_11 : f32 to vector<8x32xf32>
    %21 = arith.maximumf %19, %20 : vector<8x32xf32>
    %22 = arith.sitofp %6 : vector<8x10xi32> to vector<8x10xf32>
    %c0_12 = arith.constant 0 : index
    %c0_13 = arith.constant 0 : index
    %23 = vector.load %arg2[%c0_12, %c0_13] : memref<10x160xf32, #tpu.memory_space<vmem>>, vector<10x160xf32>
    %cst_14 = arith.constant dense<0.000000e+00> : vector<8x160xf32>
    %24 = tpu.matmul %22, %23, %cst_14 {dimension_numbers = #tpu.dot_dimension_numbers<[1], [0], [0], [1], [0, 0, 1, 1], [], []>} : vector<8x10xf32>, vector<10x160xf32>, vector<8x160xf32> -> vector<8x160xf32>
    %c0_15 = arith.constant 0 : index
    %c0_16 = arith.constant 0 : index
    %25 = vector.load %arg3[%c0_15, %c0_16] : memref<1x160xf32, #tpu.memory_space<vmem>>, vector<1x160xf32>
    %26 = vector.broadcast %25 : vector<1x160xf32> to vector<8x160xf32>
    %27 = arith.cmpf oeq, %24, %26 : vector<8x160xf32>
    %28 = arith.extui %27 : vector<8x160xi1> to vector<8x160xi32>
    %29 = arith.sitofp %28 : vector<8x160xi32> to vector<8x160xf32>
    %c0_17 = arith.constant 0 : index
    %c0_18 = arith.constant 0 : index
    %30 = vector.load %arg8[%c0_17, %c0_18] : memref<160x64xf32, #tpu.memory_space<vmem>>, vector<160x64xf32>
    %cst_19 = arith.constant dense<0.000000e+00> : vector<8x64xf32>
    %31 = tpu.matmul %29, %30, %cst_19 {dimension_numbers = #tpu.dot_dimension_numbers<[1], [0], [0], [1], [0, 0, 1, 1], [], []>} : vector<8x160xf32>, vector<160x64xf32>, vector<8x64xf32> -> vector<8x64xf32>
    %c0_20 = arith.constant 0 : index
    %c0_21 = arith.constant 0 : index
    %32 = vector.load %arg9[%c0_20, %c0_21] : memref<32x64xf32, #tpu.memory_space<vmem>>, vector<32x64xf32>
    %cst_22 = arith.constant dense<0.000000e+00> : vector<8x64xf32>
    %33 = tpu.matmul %21, %32, %cst_22 {dimension_numbers = #tpu.dot_dimension_numbers<[1], [0], [0], [1], [0, 0, 1, 1], [], []>} : vector<8x32xf32>, vector<32x64xf32>, vector<8x64xf32> -> vector<8x64xf32>
    %34 = arith.addf %31, %33 : vector<8x64xf32>
    %c0_23 = arith.constant 0 : index
    %c0_24 = arith.constant 0 : index
    %35 = vector.load %arg10[%c0_23, %c0_24] : memref<1x64xf32, #tpu.memory_space<vmem>>, vector<1x64xf32>
    %36 = vector.broadcast %35 : vector<1x64xf32> to vector<8x64xf32>
    %37 = arith.addf %34, %36 : vector<8x64xf32>
    %cst_25 = arith.constant 0.000000e+00 : f32
    %38 = vector.broadcast %cst_25 : f32 to vector<8x64xf32>
    %39 = arith.maximumf %37, %38 : vector<8x64xf32>
    %c0_26 = arith.constant 0 : index
    %c0_27 = arith.constant 0 : index
    %40 = vector.load %arg11[%c0_26, %c0_27] : memref<1x64xf32, #tpu.memory_space<vmem>>, vector<1x64xf32>
    %cst_28 = arith.constant dense<0.000000e+00> : vector<1x8xf32>
    %41 = tpu.matmul %40, %39, %cst_28 {dimension_numbers = #tpu.dot_dimension_numbers<[1], [1], [0], [0], [0, 0, 1, 0], [], []>} : vector<1x64xf32>, vector<8x64xf32>, vector<1x8xf32> -> vector<1x8xf32>
    %c0_29 = arith.constant 0 : index
    %c0_30 = arith.constant 0 : index
    %42 = vector.load %arg12[%c0_29, %c0_30] : memref<1x1xf32, #tpu.memory_space<vmem>>, vector<1x1xf32>
    %43 = vector.broadcast %42 : vector<1x1xf32> to vector<1x8xf32>
    %44 = arith.addf %41, %43 : vector<1x8xf32>
    %45 = arith.negf %44 : vector<1x8xf32>
    %46 = math.exp %45 : vector<1x8xf32>
    %cst_31 = arith.constant 1.000000e+00 : f32
    %47 = vector.broadcast %cst_31 : f32 to vector<1x8xf32>
    %48 = arith.addf %47, %46 : vector<1x8xf32>
    %49 = arith.divf %47, %48 : vector<1x8xf32>
    %c0_32 = arith.constant 0 : index
    %c0_33 = arith.constant 0 : index
    %50 = vector.load %arg13[%c0_32, %c0_33] : memref<1x8xf32, #tpu.memory_space<vmem>>, vector<1x8xf32>
    tpu.vector_store %arg13[%c0_32, %c0_33], %49 {strides = array<i32>} : memref<1x8xf32, #tpu.memory_space<vmem>>, vector<1x8xf32>,
    return
  }
  func.func @transform_0(%arg0: i32) -> (i32, i32) {
    %c0_i32 = arith.constant 0 : i32
    %c0_i32_0 = arith.constant 0 : i32
    return %arg0, %c0_i32 : i32, i32
  }
  func.func @transform_1(%arg0: i32) -> (i32, i32) {
    %c0_i32 = arith.constant 0 : i32
    %c0_i32_0 = arith.constant 0 : i32
    %c0_i32_1 = arith.constant 0 : i32
    return %c0_i32, %c0_i32_0 : i32, i32
  }
  func.func @transform_2(%arg0: i32) -> (i32, i32) {
    %c0_i32 = arith.constant 0 : i32
    %c0_i32_0 = arith.constant 0 : i32
    %c0_i32_1 = arith.constant 0 : i32
    return %c0_i32, %c0_i32_0 : i32, i32
  }
  func.func @transform_3(%arg0: i32) -> (i32, i32) {
    %c0_i32 = arith.constant 0 : i32
    %c0_i32_0 = arith.constant 0 : i32
    %c0_i32_1 = arith.constant 0 : i32
    return %c0_i32, %c0_i32_0 : i32, i32
  }
  func.func @transform_4(%arg0: i32) -> (i32, i32) {
    %c0_i32 = arith.constant 0 : i32
    %c0_i32_0 = arith.constant 0 : i32
    %c0_i32_1 = arith.constant 0 : i32
    return %c0_i32, %c0_i32_0 : i32, i32
  }
  func.func @transform_5(%arg0: i32) -> (i32, i32) {
    %c0_i32 = arith.constant 0 : i32
    %c0_i32_0 = arith.constant 0 : i32
    %c0_i32_1 = arith.constant 0 : i32
    return %c0_i32, %c0_i32_0 : i32, i32
  }
  func.func @transform_6(%arg0: i32) -> (i32, i32) {
    %c0_i32 = arith.constant 0 : i32
    %c0_i32_0 = arith.constant 0 : i32
    %c0_i32_1 = arith.constant 0 : i32
    return %c0_i32, %c0_i32_0 : i32, i32
  }
  func.func @transform_7(%arg0: i32) -> (i32, i32) {
    %c0_i32 = arith.constant 0 : i32
    %c0_i32_0 = arith.constant 0 : i32
    %c0_i32_1 = arith.constant 0 : i32
    return %c0_i32, %c0_i32_0 : i32, i32
  }
  func.func @transform_8(%arg0: i32) -> (i32, i32) {
    %c0_i32 = arith.constant 0 : i32
    %c0_i32_0 = arith.constant 0 : i32
    %c0_i32_1 = arith.constant 0 : i32
    return %c0_i32, %c0_i32_0 : i32, i32
  }
  func.func @transform_9(%arg0: i32) -> (i32, i32) {
    %c0_i32 = arith.constant 0 : i32
    %c0_i32_0 = arith.constant 0 : i32
    %c0_i32_1 = arith.constant 0 : i32
    return %c0_i32, %c0_i32_0 : i32, i32
  }
  func.func @transform_10(%arg0: i32) -> (i32, i32) {
    %c0_i32 = arith.constant 0 : i32
    %c0_i32_0 = arith.constant 0 : i32
    %c0_i32_1 = arith.constant 0 : i32
    return %c0_i32, %c0_i32_0 : i32, i32
  }
  func.func @transform_11(%arg0: i32) -> (i32, i32) {
    %c0_i32 = arith.constant 0 : i32
    %c0_i32_0 = arith.constant 0 : i32
    %c0_i32_1 = arith.constant 0 : i32
    return %c0_i32, %c0_i32_0 : i32, i32
  }
  func.func @transform_12(%arg0: i32) -> (i32, i32) {
    %c0_i32 = arith.constant 0 : i32
    %c0_i32_0 = arith.constant 0 : i32
    return %c0_i32, %arg0 : i32, i32
  }
}

</mosaic_0001>

<bundles_post_ra>
// kernel: lol_model_onehot.1
= control target key start
LH: loop header
LB: loop body
LE: loop exit
PB: predicated region body
PF: predicated region fallthrough
CT: control target
= control target key end

     0   :  { %s1064_s0 = inlined_call_operand.vmem [shape: f32[8,22], index: 0, kind: input, shape index: {}]   ;;  %s1065_s1 = inlined_call_operand.vmem [shape: f32[10,160], index: 1, kind: input, shape index: {}]   ;;  %s1066_s2 = inlined_call_operand.vmem [shape: f32[1,160], index: 2, kind: input, shape index: {}]   ;;  %s1067_s3 = inlined_call_operand.vmem [shape: f32[12,64], index: 3, kind: input, shape index: {}]   ;;  %s1068_s4 = inlined_call_operand.vmem [shape: f32[1,64], index: 4, kind: input, shape index: {}]   ;;  %s1069_s5 = inlined_call_operand.vmem [shape: f32[64,32], index: 5, kind: input, shape index: {}]   ;;  %s1070_s6 = inlined_call_operand.vmem [shape: f32[1,32], index: 6, kind: input, shape index: {}]   ;;  %s1071_s7 = inlined_call_operand.vmem [shape: f32[160,64], index: 7, kind: input, shape index: {}]   ;;  %s1072_s8 = inlined_call_operand.vmem [shape: f32[32,64], index: 8, kind: input, shape index: {}]   ;;  %s1073_s9 = inlined_call_operand.vmem [shape: f32[1,64], index: 9, kind: input, shape index: {}]   ;;  %s1074_s10 = inlined_call_operand.vmem [shape: f32[1,64], index: 10, kind: input, shape index: {}]   ;;  %s1075_s11 = inlined_call_operand.<no memory space> [shape: f32[1,1], index: 11, kind: input, shape index: {}]   ;;  %s1076_s12 = inlined_call_operand.hbm [shape: f32[1,8], index: 12, kind: output, shape index: {}]  }
   0x1   :  { %v17_v0 = vstv %s1075_s11 }
   0x2   :  { %18 = vst [vmem:[#allocation2] sm:$0x1] %v17_v0 }
   0x3   :  { %v878_v1 = vld [vmem:[%s1064_s0] sm:$0xff]  ;;  %v51_v3 = vld [vmem:[%s1067_s3 + $0x8] sm:$0xf]  ;;  %s799_s29 = smov 118   ;;  %v800_v4 = vmov 0.0|0.0   ;;  %vm65_vm0 = vcmask 1043456  }
   0x4   :  { %v50_v2 = vld [vmem:[%s1067_s3] sm:$0xff]  ;;  %60 = vrot.lane.b32.xlu0 %v878_v1, %s799_s29  ;;  %702 = vmatprep.subr.bf16.mxu1 %v800_v4  ;;  %vm801_vm1 = vmmov 1   ;;  %vm802_vm3 = vmmov 0   ;;  %v803_v6 = vmov 0.0  }
   0x5   :  { %v703_v5 = vpack.c.bf16 %v51_v3, %v50_v2  ;;  %vm704_vm2 = vmpackc.low %vm65_vm0, %vm801_vm1  ;;  %730 = vmatprep.subr.bf16.mxu0 %v800_v4  ;;  %664 = vmatprep.mubr.msk.f32.mxu1 %vm802_vm3, %v803_v6 }
   0x7   :  { %705 = vmatpush3.bf16.msk.msra.mxu1 %vm704_vm2, %v703_v5 }
   0x8   :  { %19 = vsyncpa [#allocation4], 0  ;;  %706 = vmatprep.subr.bf16.mxu1 %v800_v4  ;;  %v140_v7 = vld [vmem:[%s1069_s5] sm:$0xff]  ;;  %v141_v8 = vld [vmem:[%s1069_s5 + $0x8] sm:$0xff]  ;;  %vm62_vm4 = vcmask 97280   ;;  %vm239_vm5 = vcmask 1041408   ;;  %v760_v48 = vtrunc.f32 %v878_v1 }
   0x9   :  { %v707_v9 = vpack.c.bf16 %v141_v8, %v140_v7  ;;  %v142_v10 = vld [vmem:[%s1069_s5 + $0x10] sm:$0xff]  ;;  %v143_v11 = vld [vmem:[%s1069_s5 + $0x18] sm:$0xff]  ;;  %v144_v14 = vld [vmem:[%s1069_s5 + $0x20] sm:$0xff]  ;;  %vm155_vm9 = vcmask 523264   ;;  %vm235_vm10 = vcmask 80896   ;;  %vm359_vm11 = vcmask 261120  }
   0xa   :  { %v710_v13 = vpack.c.bf16 %v143_v11, %v142_v10  ;;  %v145_v15 = vld [vmem:[%s1069_s5 + $0x28] sm:$0xff]  ;;  %v146_v17 = vld [vmem:[%s1069_s5 + $0x30] sm:$0xff]  ;;  %v147_v18 = vld [vmem:[%s1069_s5 + $0x38] sm:$0xff]  ;;  %v761_v49 = vcvt.f32.s32 %v760_v48  ;;  %v319_v11 = vlaneseq  ;;  %vm608_vm14 = vcmask 57344  }
   0xb   :  { %v713_v16 = vpack.c.bf16 %v145_v15, %v144_v14  ;;  %v716_v19 = vpack.c.bf16 %v147_v18, %v146_v17  ;;  %v232_v20 = vld [vmem:[%s1065_s1 + $0x8] sm:$0xff]  ;;  %v234_v21 = vld [vmem:[%s1065_s1 + $0x18] sm:$0x3]  ;;  %vm929_vm6 = vmpackc.low %vm239_vm5, %vm801_vm1 }
   0xc   :  { %v718_v22 = vpack.c.bf16 %v234_v21, %v232_v20  ;;  %v335_v24 = vld [vmem:[%s1071_s7] sm:$0xff]  ;;  %v336_v25 = vld [vmem:[%s1071_s7 + $0x8] sm:$0xff]  ;;  %v337_v26 = vld [vmem:[%s1071_s7 + $0x10] sm:$0xff]  ;;  %vm46_vm7 = vcmp.gt.s32.totalorder %v761_v49, 0 }
   0xd   :  { %v731_v27 = vpack.c.bf16 %v336_v25, %v335_v24  ;;  %v338_v28 = vld [vmem:[%s1071_s7 + $0x18] sm:$0xff]  ;;  %v339_v30 = vld [vmem:[%s1071_s7 + $0x20] sm:$0xff]  ;;  %v340_v31 = vld [vmem:[%s1071_s7 + $0x28] sm:$0xff]  ;;  %v47_v50 = vsel %vm46_vm7, %v761_v49, 0  ;;  %v804_v25 = vmov 1.0  }
   0xe   :  { %v734_v29 = vpack.c.bf16 %v338_v28, %v337_v26  ;;  %v737_v32 = vpack.c.bf16 %v340_v31, %v339_v30  ;;  %v341_v33 = vld [vmem:[%s1071_s7 + $0x30] sm:$0xff]  ;;  %v342_v34 = vld [vmem:[%s1071_s7 + $0x38] sm:$0xff]  ;;  %v343_v36 = vld [vmem:[%s1071_s7 + $0x40] sm:$0xff]  ;;  %vm48_vm8 = vcmp.lt.s32.totalorder %v47_v50, 15 }
   0xf   :  { %732 = vmatpush1.bf16.msra.mxu0 %v731_v27  ;;  %v740_v35 = vpack.c.bf16 %v342_v34, %v341_v33  ;;  %v344_v37 = vld [vmem:[%s1071_s7 + $0x48] sm:$0xff]  ;;  %v345_v39 = vld [vmem:[%s1071_s7 + $0x50] sm:$0xff]  ;;  %v346_v40 = vld [vmem:[%s1071_s7 + $0x58] sm:$0xff]  ;;  %v49_v57 = vsel %vm48_vm8, %v47_v50, 15  ;;  %v805_v27 = vmov 0  }
  0x10   :  { %733 = vmatprep.subr.bf16.mxu0 %v800_v4  ;;  %v743_v38 = vpack.c.bf16 %v344_v37, %v343_v36  ;;  %v746_v41 = vpack.c.bf16 %v346_v40, %v345_v39  ;;  %v347_v42 = vld [vmem:[%s1071_s7 + $0x60] sm:$0xff]  ;;  %v348_v43 = vld [vmem:[%s1071_s7 + $0x68] sm:$0xff]  ;;  %v349_v45 = vld [vmem:[%s1071_s7 + $0x70] sm:$0xff]  ;;  %v230_v62 = vcvt.s32.f32 %v49_v57  ;;  %770 = vset.pattern.permute.xlu0 %v805_v27 }
  0x11   :  { %v749_v44 = vpack.c.bf16 %v348_v43, %v347_v42  ;;  %v350_v46 = vld [vmem:[%s1071_s7 + $0x78] sm:$0xff]  ;;  %v624_v51 = vld [vmem:[%s1068_s4] ss:$0 sm:$0xff]  ;;  %v233_v53 = vld [vmem:[%s1065_s1 + $0x10] sm:$0x3] }
  0x12   :  { %v752_v47 = vpack.c.bf16 %v350_v46, %v349_v45  ;;  %v231_v52 = vld [vmem:[%s1065_s1] sm:$0xff]  ;;  %v356_v61 = vld [vmem:[%s1072_s8 + $0x8] sm:$0xff]  ;;  %v357_v0 = vld [vmem:[%s1072_s8 + $0x10] sm:$0xff] }
  0x13   :  { %735 = vmatpush1.bf16.msra.mxu0 %v734_v29  ;;  %v721_v58 = vpack.c.bf16 %v233_v53, %v231_v52  ;;  %v355_v60 = vld [vmem:[%s1072_s8] sm:$0xff]  ;;  %v358_v1 = vld [vmem:[%s1072_s8 + $0x18] sm:$0xff]  ;;  %v352_v5 = vld [vmem:[%s1071_s7 + $0x88] sm:$0xff] }
  0x14   :  { %736 = vmatprep.subr.bf16.mxu0 %v800_v4  ;;  %v725_v63 = vpack.c.bf16 %v356_v61, %v355_v60  ;;  %v351_v2 = vld [vmem:[%s1071_s7 + $0x80] sm:$0xff]  ;;  %v728_v3 = vpack.c.bf16 %v358_v1, %v357_v0  ;;  %v353_v8 = vld [vmem:[%s1071_s7 + $0x90] sm:$0xff] }
  0x15   :  { %v755_v7 = vpack.c.bf16 %v352_v5, %v351_v2  ;;  %v317_v15 = vld [vmem:[%s1066_s2] sm:$0x3] }
  0x16   :  { %v516_v26 = vld [vmem:[#allocation2] sm:$0x1] }
  0x17   :  { %738 = vmatpush1.bf16.msra.mxu0 %v737_v32  ;;  %519 = vperm.xlu0 %770, %v516_v26   ;;  %v637_v31 = vld [vmem:[%s1073_s9] ss:$0 sm:$0xff]  ;;  %s806_s9 = smov [#allocation3]  }
  0x18   :  { %739 = vmatprep.subr.bf16.mxu0 %v800_v4  ;;  %s616_s19 = sshll.u32 %s806_s9, 4  ;;  %s617_s19 = int_to_ptr.vmem [resolvable:$true] %s616_s19 }
  0x19   :  { %s775_s20 = scalar_lea.vmem %s617_s19, 16  ;;  %p780_p1 = scmp.lt.s32.totalorder %s617_s19, %s617_s19 }
  0x1a   :  { %p776_p0 = scmp.ne.s32.totalorder %s617_s19, %s775_s20 }
  0x1b   :  { %741 = vmatpush1.bf16.msra.mxu0 %v740_v35 }
  0x1c   :  { %742 = vmatprep.subr.bf16.mxu0 %v800_v4 }
  0x1f   :  { %744 = vmatpush1.bf16.msra.mxu0 %v743_v38 }
  0x20   :  { %745 = vmatprep.subr.bf16.mxu0 %v800_v4 }
  0x23   :  { %747 = vmatpush1.bf16.msra.mxu0 %v746_v41 }
  0x24   :  { %748 = vmatprep.subr.bf16.mxu0 %v800_v4 }
  0x27   :  { %750 = vmatpush1.bf16.msra.mxu0 %v749_v44 }
  0x28   :  { %751 = vmatprep.subr.bf16.mxu0 %v800_v4 }
  0x2b   :  { %753 = vmatpush1.bf16.msra.mxu0 %v752_v47 }
  0x2c   :  { %754 = vmatprep.subr.bf16.mxu0 %v800_v4 }
  0x2f   :  { %756 = vmatpush1.bf16.msra.mxu0 %v755_v7 }
  0x30   :  { %757 = vmatprep.subr.bf16.mxu0 %v800_v4 }
  0x76   :  { %v61_v12 = vpop.permute.xlu0 %60 }
  0x77   :  { %665 = vmatmul.mubr.msk.f32.vlgmr.msra.gmra.mrb[0].mxu1 %vm62_vm4, %v61_v12  ;;  %v320_v12 = vshrl.u32 %v319_v11, 7 }
  0x78   :  { %708 = vmatpush3.bf16.msra.mxu1 %v707_v9  ;;  %683 = vmatprep.mubr.msk.f32.mxu1 %vm802_vm3, %v803_v6  ;;  %v354_v9 = vld [vmem:[%s1071_s7 + $0x98] sm:$0xff] }
  0x79   :  { %709 = vmatprep.subr.bf16.mxu1 %v800_v4  ;;  %v758_v10 = vpack.c.bf16 %v354_v9, %v353_v8  ;;  %v325_v14 = vsub.s32 1, %v320_v12  ;;  %v321_v17 = vsub.s32 0, %v320_v12 }
  0x7b   :  { %759 = vmatpush1.bf16.msra.mxu0 %v758_v10  ;;  %v326_v20 = vrot.slane %v317_v15, %v325_v14 }
  0x7c   :  { %711 = vmatpush3.bf16.msra.mxu1 %v710_v13  ;;  %v627_v13 = vld [vmem:[%s1070_s6] ss:$0 sm:$0xff] }
  0x7d   :  { %712 = vmatprep.subr.bf16.mxu1 %v800_v4 }
  0x80   :  { %714 = vmatpush3.bf16.msra.mxu1 %v713_v16 }
  0x81   :  { %715 = vmatprep.subr.bf16.mxu1 %v800_v4 }
  0x84   :  { %717 = vmatpush3.bf16.msra.mxu1 %v716_v19 }
  0x85   :  { %720 = vmatprep.subr.msk.bf16.mxu1 %vm929_vm6, %v718_v22  ;;  %v322_v22 = vrot.slane %v317_v15, %v321_v17 }
  0x96   :  { %v520_v36 = vpop.permute.xlu0 %519 }
  0x97   :  { %v525_v37 = vrot.slane %v520_v36, %v321_v17 }
 0x14a   :  { %v135_v54 = vpop.f32.mrb[0].mxu1 }
 0x14b   :  { %v136_v55 = vadd.f32 %v624_v51, %v135_v54  ;;  %v666_v56 = vpop.f32.mrb[1].mxu1 }
 0x14d   :  { %v139_v59 = vmax.f32 %v136_v55, 0.0 }
 0x14f   :  { %684 = vmatmul.mubr.msk.f32.vlgmr.msra.gmra.mrb[2].mxu1 %vm155_vm9, %v139_v59 }
 0x150   :  { %723 = vmatpush1.bf16.msk.msra.mxu1 %vm929_vm6, %v721_v58  ;;  %310 = vmatprep.mubr.f32.mxu1 %v803_v6 }
 0x151   :  { %724 = vmatprep.subr.bf16.mxu1 %v800_v4 }
 0x153   :  { %631 = vmatmul.mubr.msk.f32.vlgmr.msra.gmra.mrb[4].mxu1 %vm235_vm10, %v230_v62 }
 0x154   :  { %726 = vmatpush3.bf16.msra.mxu1 %v725_v63  ;;  %694 = vmatprep.mubr.msk.f32.mxu1 %vm802_vm3, %v803_v6 }
 0x155   :  { %727 = vmatprep.subr.bf16.mxu1 %v800_v4 }
 0x158   :  { %729 = vmatpush3.bf16.msra.mxu1 %v728_v3 }
 0x159   :  { %697 = vmatprep.subr.mxu1 %v803_v6 }
 0x222   :  { %v225_v16 = vpop.f32.mrb[2].mxu1 }
 0x223   :  { %v226_v18 = vadd.f32 %v627_v13, %v225_v16  ;;  %v685_v19 = vpop.f32.mrb[3].mxu1 }
 0x225   :  { %v229_v4 = vmax.f32 %v226_v18, 0.0 }
 0x226   :  { %v312_v21 = vpop.f32.mrb[4].mxu1 }
 0x227   :  { %v314_v23 = vpop.f32.mrb[5].mxu1  ;;  %695 = vmatmul.mubr.msk.f32.vlgmr.msra.gmra.mrb[6].mxu1 %vm359_vm11, %v229_v4  ;;  %vm329_vm13 = vcmp.eq.f32.partialorder %v312_v21, %v322_v22 }
 0x228   :  { %vm330_vm12 = vcmp.eq.f32.partialorder %v314_v23, %v326_v20  ;;  %699 = vmatprep.mubr.msk.f32.mxu1 %vm802_vm3, %v803_v6 }
 0x229   :  { %v633_v24 = vsel %vm330_vm12, 1.0, %v803_v6  ;;  %v515_v6 = vld [vmem:[%s1074_s10] sm:$0x1]  ;;  %s779_s10 = scalar_lea.vmem %s617_s19, 32 }
 0x22a   :  { %635 = vmatprep.mubr.msk.f32.mxu0 %vm359_vm11, %v633_v24  ;;  %p781_p2 = scmp.lt.s32.totalorder %s779_s10, %s775_s20 }
 0x22b   :  { %636 = vmatmul.mubr.msk.f32.vlgmr.msra.gmra.mrb[0].mxu0 %vm329_vm13, %v804_v25 }
 0x22c   :  { %p782_p3 = por %p781_p2, %p780_p1 }
 0x22e   :  { %p783_p4 = pnand %p782_p3, %p776_p0 }
 0x2fa   :  { %v429_v28 = vpop.f32.mrb[6].mxu1 }
 0x2fb   :  { %v696_v29 = vpop.f32.mrb[7].mxu1 }
 0x2fe   :  { %v502_v30 = vpop.f32.mrb[0].mxu0 }
 0x2ff   :  { %v503_v32 = vadd.f32 %v502_v30, %v429_v28  ;;  %v504_v33 = vpop.f32.mrb[1].mxu0 }
 0x301   :  { %v513_v34 = vadd.f32 %v637_v31, %v503_v32 }
 0x303   :  { %v514_v35 = vmax.f32 %v513_v34, 0.0 }
 0x305   :  { %698 = vmatpush3.xpose.msk.msra.mxu1 %vm155_vm9, %v514_v35 }
 0x308   :  { %700 = vmatmul.mubr.msk.f32.vlgmr.msra.gmra.mrb[8].mxu1 %vm155_vm9, %v515_v6 }
 0x3db   :  { %v598_v38 = vpop.f32.mrb[8].mxu1 }
 0x3dc   :  { %v599_v39 = vadd.f32 %v598_v38, %v525_v37  ;;  %v701_v40 = vpop.f32.mrb[9].mxu1 }
 0x3de   :  { %v640_v41 = vmul.f32 -1.442695, %v599_v39 }
 0x3e0   :  { %771 = vpow2.f32 %v640_v41 }
 0x3ea   :  { %v772_v42 = vpop.eup %771 }
 0x3eb   :  { %v605_v43 = vadd.f32 1.0, %v772_v42 }
 0x3ed   :  { %773 = vrcp.f32 %v605_v43 }
 0x3f7   :  { %v774_v44 = vpop.eup %773 }
 0x3f8   :  { %609 = vst.msk [vmem:[#allocation3] sm:$0x1] %vm608_vm14, %v774_v44 }
 0x3f9   :  { %786 = shalt.err (!%p783_p4)
}
 0x3fa   :  { %s787_s23 = scalar_lea.hbm %s1076_s12, 16 }
 0x3fb   :  { %p788_p5 = scmp.ne.s32.totalorder %s1076_s12, %s787_s23  ;;  %p791_p6 = scmp.lt.u32.totalorder %s787_s23, %s1076_s12 }
 0x3fd   :  { %p793_p7 = pnand %p791_p6, %p788_p5 }
 0x3ff   :  { %796 = shalt.err (!%p793_p7)
}
 0x400   :  { %619 = dma.vmem_to_hbm [thread:$0]  %s617_s19, 16, %s1076_s12, [#allocation4]  }
 0x401   :  { %797 = dma.done.wait [#allocation4], 16  }
 0x402   :  { %798 = vsyncadd [#allocation4], 4294967280 }
 0x403   :  { %623 = vsyncpa [#allocation4], 1 }

</bundles_post_ra>
